<compile_context>
chip_gen: v6e
topology: v6e:2x2x1
jax: 0.10.0
libtpu: 0.0.40
codegen_flags: <defaults>
</compile_context>

<pallas_src>
import math

import jax
import jax.numpy as jnp
from jax.experimental import pallas as pl
from jax.experimental.pallas import tpu as pltpu


def _pe_add_kernel(x_ref, pe_ref, o_ref):
    # x_ref / o_ref: (TB, TC) slab of the flattened [B, S*D] input.
    # pe_ref:        (1,  TC) f32 slab of the flattened positional-encoding table.
    x = x_ref[...].astype(jnp.float32)
    o_ref[...] = (x + pe_ref[...]).astype(o_ref.dtype)


def _build_pe_table(S, D):
    """(S, D) float32 sinusoidal PE table matching the PyTorch buffer (even D)."""
    position = jnp.arange(S, dtype=jnp.float32)[:, None]                    # (S, 1)
    div_term = jnp.exp(jnp.arange(0, D, 2, dtype=jnp.float32)
                       * (-math.log(10000.0) / D))                          # (D//2,)
    angles = position * div_term                                            # (S, D//2)
    # Interleave: even columns sin, odd columns cos.
    return jnp.stack([jnp.sin(angles), jnp.cos(angles)], axis=-1).reshape(S, D)


def _pick_tiles(B, N, itemsize, vmem_budget_bytes=8 << 20):
    """Largest (row_tile, col_tile) for the flattened [B, N] view such that:
       * col_tile is a multiple-of-128 divisor of N, or N itself (full extent),
       * row_tile is a multiple-of-8 divisor of B, or B itself (full extent),
       * double-buffered x-in + x-out blocks plus the double-buffered f32 PE block
         fit the VMEM budget."""
    def block_bytes(tb, tc):
        return 4 * tb * tc * itemsize + 2 * tc * 4

    tc_opts = sorted({N} | {c for c in range(128, N + 1, 128) if N % c == 0},
                     reverse=True)
    tb_opts = sorted({B} | {r for r in range(8, B + 1, 8) if B % r == 0},
                     reverse=True)

    for tb in tb_opts:
        for tc in tc_opts:
            if block_bytes(tb, tc) <= vmem_budget_bytes:
                return tb, tc
    # Fall back to the smallest legal tile (may exceed the soft budget).
    return tb_opts[-1], tc_opts[-1]


def sinusoidal_positional_encoding(x, max_seq_length=5000):
    """Adds sinusoidal positional encoding to x of shape [B, S, D]."""
    B, S, D = x.shape
    assert S <= max_seq_length
    assert D % 2 == 0, "d_model must be even (as in the reference module)"

    N = S * D
    pe = _build_pe_table(S, D).reshape(1, N)     # built once, outside the kernel
    x2 = x.reshape(B, N)                         # lane-dense 2-D view (free reshape)
    tb, tc = _pick_tiles(B, N, x.dtype.itemsize)

    out2 = pl.pallas_call(
        _pe_add_kernel,
        out_shape=jax.ShapeDtypeStruct((B, N), x.dtype),
        grid_spec=pltpu.PrefetchScalarGridSpec(
            num_scalar_prefetch=0,
            # Column-tile axis outer, batch inner: the PE block index does not change
            # across the inner batch loop, so its tile stays resident in VMEM.
            grid=(N // tc, B // tb),
            in_specs=[
                pl.BlockSpec((tb, tc), lambda c, b: (b, c)),   # x slab
                pl.BlockSpec((1, tc), lambda c, b: (0, c)),    # pe slab (batch-invariant)
            ],
            out_specs=pl.BlockSpec((tb, tc), lambda c, b: (b, c)),
        ),
        input_output_aliases={0: 0},   # in-place x + pe at the HLO level
        compiler_params=pltpu.CompilerParams(
            dimension_semantics=("parallel", "parallel"),
        ),
    )(x2, pe)
    return out2.reshape(B, S, D)


def _reference_pe(S, D, dtype=jnp.float32):
    # Pure-JAX reference mirroring the PyTorch buffer construction (at[].set path,
    # deliberately a different construction from the wrapper's stack/reshape).
    position = jnp.arange(S, dtype=jnp.float32)[:, None]            # (S, 1)
    div_term = jnp.exp(jnp.arange(0, D, 2, dtype=jnp.float32)
                       * (-math.log(10000.0) / D))                  # (D//2,)
    pe = jnp.zeros((S, D), dtype=jnp.float32)
    pe = pe.at[:, 0::2].set(jnp.sin(position * div_term))
    pe = pe.at[:, 1::2].set(jnp.cos(position * div_term))
    return pe.astype(dtype)


if __name__ == "__main__":
    key = jax.random.PRNGKey(0)
    B, S, D = 2, 8, 32   # batch, seq_length, d_model (even, as in the paper)
    x = jax.random.normal(key, (B, S, D), dtype=jnp.float32)

    # Reference computed BEFORE the (aliased) kernel call.
    ref = x + _reference_pe(S, D)[None, :, :]

    out = sinusoidal_positional_encoding(x)
    out = jax.block_until_ready(out)

    assert out.shape == (B, S, D)
    assert out.dtype == x.dtype
    assert jnp.allclose(out, ref, atol=1e-5, rtol=1e-5), "mismatch vs reference"

    print("KERNEL_OK")
</pallas_src>

<mosaic_0001>
module attributes {stable_mosaic.version = 11 : i64} {
  func.func @_pe_add_kernel(%arg0: i32, %arg1: i32, %arg2: memref<2x256xf32, #tpu.memory_space<vmem>>, %arg3: memref<1x256xf32, #tpu.memory_space<vmem>>, %arg4: memref<2x256xf32, #tpu.memory_space<vmem>>) attributes {dimension_semantics = [#tpu.dimension_semantics<parallel>, #tpu.dimension_semantics<parallel>], iteration_bounds = array<i64: 1, 1>, scalar_prefetch = 0 : i64, scratch_operands = 0 : i64, tpu.core_type = #tpu.core_type<tc>, window_params = [{transform_indices = @transform_0, window_bounds = array<i64: 2, 256>}, {transform_indices = @transform_1, window_bounds = array<i64: 1, 256>}, {transform_indices = @transform_2, window_bounds = array<i64: 2, 256>}]} {
    %c0 = arith.constant 0 : index
    %c0_0 = arith.constant 0 : index
    %0 = vector.load %arg2[%c0, %c0_0] : memref<2x256xf32, #tpu.memory_space<vmem>>, vector<2x256xf32>
    %c0_1 = arith.constant 0 : index
    %c0_2 = arith.constant 0 : index
    %1 = vector.load %arg3[%c0_1, %c0_2] : memref<1x256xf32, #tpu.memory_space<vmem>>, vector<1x256xf32>
    %2 = vector.broadcast %1 : vector<1x256xf32> to vector<2x256xf32>
    %3 = arith.addf %0, %2 : vector<2x256xf32>
    %c0_3 = arith.constant 0 : index
    %c0_4 = arith.constant 0 : index
    %4 = vector.load %arg4[%c0_3, %c0_4] : memref<2x256xf32, #tpu.memory_space<vmem>>, vector<2x256xf32>
    tpu.vector_store %arg4[%c0_3, %c0_4], %3 {strides = array<i32>} : memref<2x256xf32, #tpu.memory_space<vmem>>, vector<2x256xf32>,
    return
  }
  func.func @transform_0(%arg0: i32, %arg1: i32) -> (i32, i32) {
    %c0_i32 = arith.constant 0 : i32
    return %arg1, %arg0 : i32, i32
  }
  func.func @transform_1(%arg0: i32, %arg1: i32) -> (i32, i32) {
    %c0_i32 = arith.constant 0 : i32
    %c0_i32_0 = arith.constant 0 : i32
    return %c0_i32, %arg0 : i32, i32
  }
  func.func @transform_2(%arg0: i32, %arg1: i32) -> (i32, i32) {
    %c0_i32 = arith.constant 0 : i32
    return %arg1, %arg0 : i32, i32
  }
}

</mosaic_0001>

<bundles_post_ra>
// kernel: tpu_custom_call.1
= control target key start
LH: loop header
LB: loop body
LE: loop exit
PB: predicated region body
PF: predicated region fallthrough
CT: control target
= control target key end

     0   :  { %7 = vsyncpa [#allocation3], 0  ;;  %s135_s0 = inlined_call_operand.hbm [shape: f32[2,256], index: 0, kind: input, shape index: {}, may-alias: {0,2}]   ;;  %s136_s1 = inlined_call_operand.vmem [shape: f32[1,256], index: 1, kind: input, shape index: {}]   ;;  %s137_s2 = inlined_call_operand.hbm [shape: f32[2,256], index: 2, kind: output, shape index: {}, may-alias: {0,2}]  }
   0x1   :  { %8 = vsyncpa [#allocation4], 0  ;;  %s108_s9 = smov [#allocation2]  }
   0x2   :  { %s15_s10 = sshll.u32 %s108_s9, 4  ;;  %s16_s10 = int_to_ptr.vmem [resolvable:$true] %s15_s10 }
   0x3   :  { %s72_s11 = scalar_lea.vmem %s16_s10, 64  ;;  %p77_p1 = scmp.lt.s32.totalorder %s16_s10, %s16_s10 }
   0x4   :  { %p73_p0 = scmp.ne.s32.totalorder %s16_s10, %s72_s11  ;;  %p78_p2 = scmp.lt.s32.totalorder %s72_s11, %s72_s11 }
   0x6   :  { %p79_p3 = por %p78_p2, %p77_p1 }
   0x8   :  { %p80_p4 = pnand %p79_p3, %p73_p0 }
   0xa   :  { %83 = shalt.err (!%p80_p4)
}
   0xb   :  { %18 = dma.hbm_to_vmem [thread:$0]  %s135_s0, 64, %s16_s10, [#allocation3]  }
   0xc   :  { %104 = dma.done.wait [#allocation3], 64  }
   0xd   :  { %105 = vsyncadd [#allocation3], 4294967232  ;;  %v27_v0 = vlaneseq  ;;  %v109_v1 = vmov 1983009808   ;;  %v25_v7 = vld [vmem:[%s136_s1] sm:$0x3] }
   0xe   :  { %v37_v2 = vunpack.c.l.s4 %v109_v1  ;;  %v24_v12 = vld [vmem:[#allocation2] sm:$0xf]  ;;  %s110_s16 = smov [#allocation5]  }
   0xf   :  { %v28_v3 = vshrl.u32 %v27_v0, 7  ;;  %s52_s0 = sshll.u32 %s110_s16, 4  ;;  %s53_s0 = int_to_ptr.vmem [resolvable:$true] %s52_s0 }
  0x10   :  { %v38_v6 = vunpack.c.0.s8 %v37_v2  ;;  %s84_s17 = scalar_lea.vmem %s53_s0, 64  ;;  %p89_p6 = scmp.lt.s32.totalorder %s53_s0, %s53_s0 }
  0x11   :  { %v29_v4 = vsub.s32 0, %v28_v3  ;;  %v33_v5 = vsub.s32 1, %v28_v3  ;;  %p85_p5 = scmp.ne.s32.totalorder %s53_s0, %s84_s17  ;;  %p90_p7 = scmp.lt.s32.totalorder %s84_s17, %s84_s17 }
  0x12   :  { %v41_v10 = vsub.s32 %v38_v6, %v28_v3 }
  0x13   :  { %v30_v8 = vrot.slane %v25_v7, %v29_v4  ;;  %v34_v9 = vrot.slane %v25_v7, %v33_v5  ;;  %p91_p8 = por %p90_p7, %p89_p6 }
  0x15   :  { %v35_v11 = vcombine.low %v30_v8, %v34_v9  ;;  %p92_p9 = pnand %p91_p8, %p85_p5 }
  0x17   :  { %v42_v13 = vrot.slane %v35_v11, %v41_v10 }
  0x19   :  { %v44_v14 = vadd.f32 %v42_v13, %v24_v12 }
  0x1b   :  { %45 = vst [vmem:[#allocation5] sm:$0xf] %v44_v14 }
  0x1c   :  { %95 = shalt.err (!%p92_p9)
}
  0x1d   :  { %55 = dma.vmem_to_hbm [thread:$0]  %s53_s0, 64, %s137_s2, [#allocation4]  }
  0x1e   :  { %106 = dma.done.wait [#allocation4], 64  }
  0x1f   :  { %107 = vsyncadd [#allocation4], 4294967232 }
  0x20   :  { %59 = vsyncpa [#allocation3], 1 }
  0x21   :  { %60 = vsyncpa [#allocation4], 1 }

</bundles_post_ra>
